<compile_context>
chip_gen: v5e
topology: v5e:2x2
jax: 0.10.0
libtpu: 0.0.40
codegen_flags: <defaults>
</compile_context>

<pallas_src>
import functools

import jax
import jax.numpy as jnp
from jax.experimental import pallas as pl
from jax.experimental.pallas import tpu as pltpu


def _round_up(v, m):
    return (v + m - 1) // m * m


# ---------------------------------------------------------------------------
# Pass 1: conv-as-matmul (MXU) + per-channel sum / sum-of-squares accumulation
# ---------------------------------------------------------------------------
def _conv_stats_kernel(p_ref, w_ref, y_ref, s1_ref, s2_ref):
    i = pl.program_id(0)
    y = jnp.dot(p_ref[...], w_ref[...], preferred_element_type=jnp.float32)
    y_ref[...] = y

    @pl.when(i == 0)
    def _init():
        s1_ref[...] = jnp.zeros_like(s1_ref)
        s2_ref[...] = jnp.zeros_like(s2_ref)

    s1_ref[...] += jnp.sum(y, axis=0, keepdims=True)
    s2_ref[...] += jnp.sum(y * y, axis=0, keepdims=True)


# ---------------------------------------------------------------------------
# Pass 2: folded BatchNorm affine (y*scale + shift) + LeakyReLU
# ---------------------------------------------------------------------------
def _bn_lrelu_kernel(y_ref, scale_ref, shift_ref, out_ref, *, neg_slope):
    yn = y_ref[...] * scale_ref[...] + shift_ref[...]
    out_ref[...] = jnp.where(yn > 0, yn, neg_slope * yn)


def _extract_patches_nchw(x, k, stride):
    """im2col for NCHW input, no padding. Returns (M, C*k*k), Ho, Wo.

    Flattened K ordering is (c_in, kh, kw), matching PyTorch's
    weight.reshape(C_out, C_in*KH*KW).
    """
    n, c, h, w = x.shape
    ho = (h - k) // stride + 1
    wo = (w - k) // stride + 1
    patches = jnp.stack(
        [
            jnp.stack(
                [x[:, :, kh:kh + stride * ho:stride, kw:kw + stride * wo:stride]
                 for kw in range(k)],
                axis=-1,
            )
            for kh in range(k)
        ],
        axis=-2,
    )  # (N, C, Ho, Wo, KH, KW)
    patches = patches.transpose(0, 2, 3, 1, 4, 5)      # (N, Ho, Wo, C, KH, KW)
    return patches.reshape(n * ho * wo, c * k * k), ho, wo


@functools.partial(
    jax.jit, static_argnames=("stride", "eps", "neg_slope", "compute_dtype"))
def cnn_block_forward(x, weight, gamma, beta, *, stride=2, eps=1e-5,
                      neg_slope=0.2, compute_dtype=jnp.bfloat16):
    """x: (N, C_in, H, W) f32; weight: (C_out, C_in, 4, 4) f32.

    Returns (N, C_out, H_out, W_out) f32, matching the PyTorch CNNBlock
    forward (Conv -> BatchNorm2d in training mode -> LeakyReLU(0.2)).
    """
    n = x.shape[0]
    c_out, c_in, kh, kw = weight.shape
    assert kh == 4 and kw == 4

    patches, ho, wo = _extract_patches_nchw(x, 4, stride)   # (M, K)
    m, k = patches.shape

    # TPU-friendly padded sizes (zeros do not perturb the matmul or the
    # sum-based batch-norm statistics).
    k_pad = _round_up(k, 128)
    c_out_pad = _round_up(c_out, 128)        # lane-dense output dimension
    tm = min(512, _round_up(m, 8))           # M tile rows (keeps VMEM modest)
    m_pad = _round_up(m, tm)
    n_tiles = m_pad // tm

    patches_p = jnp.zeros((m_pad, k_pad), compute_dtype)
    patches_p = patches_p.at[:m, :k].set(patches.astype(compute_dtype))

    w_mat = weight.reshape(c_out, c_in * 16).T               # (K, C_out)
    w_p = jnp.zeros((k_pad, c_out_pad), compute_dtype)
    w_p = w_p.at[:k, :c_out].set(w_mat.astype(compute_dtype))

    gamma_p = jnp.zeros((1, c_out_pad), jnp.float32)
    gamma_p = gamma_p.at[0, :c_out].set(gamma.astype(jnp.float32))
    beta_p = jnp.zeros((1, c_out_pad), jnp.float32)
    beta_p = beta_p.at[0, :c_out].set(beta.astype(jnp.float32))

    itemsize = jnp.dtype(compute_dtype).itemsize
    cost = pl.CostEstimate(
        flops=2 * m_pad * k_pad * c_out_pad,
        transcendentals=0,
        bytes_accessed=(m_pad * k_pad * itemsize
                        + k_pad * c_out_pad * itemsize
                        + m_pad * c_out_pad * 4))

    # ---- Pass 1: tiled matmul + BN statistics ---------------------------
    y, s1, s2 = pl.pallas_call(
        _conv_stats_kernel,
        grid=(n_tiles,),
        in_specs=[
            pl.BlockSpec((tm, k_pad), lambda i: (i, 0)),       # patch tile
            pl.BlockSpec((k_pad, c_out_pad), lambda i: (0, 0)),  # weights
        ],
        out_specs=[
            pl.BlockSpec((tm, c_out_pad), lambda i: (i, 0)),   # raw conv y
            pl.BlockSpec((1, c_out_pad), lambda i: (0, 0)),    # sum   (resident)
            pl.BlockSpec((1, c_out_pad), lambda i: (0, 0)),    # sumsq (resident)
        ],
        out_shape=[
            jax.ShapeDtypeStruct((m_pad, c_out_pad), jnp.float32),
            jax.ShapeDtypeStruct((1, c_out_pad), jnp.float32),
            jax.ShapeDtypeStruct((1, c_out_pad), jnp.float32),
        ],
        compiler_params=pltpu.CompilerParams(
            dimension_semantics=("arbitrary",),
            vmem_limit_bytes=32 * 1024 * 1024),
        cost_estimate=cost,
    )(patches_p, w_p)

    # ---- Fold BN stats into per-channel scale / shift (tiny, in JAX) ----
    inv_m = 1.0 / float(m)
    mean = s1 * inv_m
    var = jnp.maximum(s2 * inv_m - mean * mean, 0.0)   # guard cancellation
    inv = jax.lax.rsqrt(var + eps)
    scale = gamma_p * inv
    shift = beta_p - mean * scale

    # ---- Pass 2: normalize + LeakyReLU (parallel over M tiles) ----------
    out = pl.pallas_call(
        functools.partial(_bn_lrelu_kernel, neg_slope=neg_slope),
        grid=(n_tiles,),
        in_specs=[
            pl.BlockSpec((tm, c_out_pad), lambda i: (i, 0)),
            pl.BlockSpec((1, c_out_pad), lambda i: (0, 0)),
            pl.BlockSpec((1, c_out_pad), lambda i: (0, 0)),
        ],
        out_specs=pl.BlockSpec((tm, c_out_pad), lambda i: (i, 0)),
        out_shape=jax.ShapeDtypeStruct((m_pad, c_out_pad), jnp.float32),
        compiler_params=pltpu.CompilerParams(
            dimension_semantics=("parallel",),
            vmem_limit_bytes=32 * 1024 * 1024),
    )(y, scale, shift)

    out = out[:m, :c_out]                                      # (M, C_out)
    return out.reshape(n, ho, wo, c_out).transpose(0, 3, 1, 2)  # NCHW


def _reference(x, weight, gamma, beta, *, stride=2, eps=1e-5, neg_slope=0.2,
               compute_dtype=jnp.float32):
    """Pure-JAX reference for correctness checking."""
    y = jax.lax.conv_general_dilated(
        x.astype(compute_dtype), weight.astype(compute_dtype),
        window_strides=(stride, stride), padding="VALID",
        dimension_numbers=("NCHW", "OIHW", "NCHW"),
        preferred_element_type=jnp.float32)
    mean = y.mean(axis=(0, 2, 3), keepdims=True)
    var = y.var(axis=(0, 2, 3), keepdims=True)   # biased, like BN training norm
    yn = (y - mean) * jax.lax.rsqrt(var + eps)
    yn = yn * gamma.reshape(1, -1, 1, 1) + beta.reshape(1, -1, 1, 1)
    return jnp.where(yn > 0, yn, neg_slope * yn)


if __name__ == "__main__":
    key = jax.random.PRNGKey(0)
    kx, kw = jax.random.split(key)

    N, C_IN, H, W = 2, 4, 16, 16
    C_OUT, STRIDE = 8, 2

    x = jax.random.normal(kx, (N, C_IN, H, W), dtype=jnp.float32)
    weight = jax.random.normal(kw, (C_OUT, C_IN, 4, 4), dtype=jnp.float32) * 0.1
    gamma = jnp.ones((C_OUT,), jnp.float32)   # BatchNorm2d default weight init
    beta = jnp.zeros((C_OUT,), jnp.float32)   # BatchNorm2d default bias init

    out = cnn_block_forward(x, weight, gamma, beta, stride=STRIDE)
    out = jax.block_until_ready(out)

    HO = (H - 4) // STRIDE + 1
    WO = (W - 4) // STRIDE + 1
    assert out.shape == (N, C_OUT, HO, WO)

    # Tight check vs a reference using the same bf16 matmul operands.
    ref_bf16 = _reference(x, weight, gamma, beta, stride=STRIDE,
                          compute_dtype=jnp.bfloat16)
    err_bf16 = float(jnp.max(jnp.abs(out - ref_bf16)))
    assert jnp.allclose(out, ref_bf16, atol=5e-3, rtol=5e-3), err_bf16

    # Loose sanity check vs the full-f32 PyTorch-equivalent reference.
    ref_f32 = _reference(x, weight, gamma, beta, stride=STRIDE)
    err_f32 = float(jnp.max(jnp.abs(out - ref_f32)))
    assert jnp.allclose(out, ref_f32, atol=5e-2, rtol=5e-2), err_f32

    print("KERNEL_OK")
</pallas_src>

<mosaic_0001>
module attributes {stable_mosaic.version = 11 : i64} {
  func.func @_conv_stats_kernel(%arg0: i32, %arg1: memref<104x128xbf16, #tpu.memory_space<vmem>>, %arg2: memref<128x128xbf16, #tpu.memory_space<vmem>>, %arg3: memref<104x128xf32, #tpu.memory_space<vmem>>, %arg4: memref<1x128xf32, #tpu.memory_space<vmem>>, %arg5: memref<1x128xf32, #tpu.memory_space<vmem>>) attributes {dimension_semantics = [#tpu.dimension_semantics<arbitrary>], iteration_bounds = array<i64: 1>, scalar_prefetch = 0 : i64, scratch_operands = 0 : i64, tpu.core_type = #tpu.core_type<tc>, window_params = [{transform_indices = @transform_0, window_bounds = array<i64: 104, 128>}, {pipeline_mode = #tpu.pipeline_mode<synchronous>, transform_indices = @transform_1, window_bounds = array<i64: 128, 128>}, {transform_indices = @transform_2, window_bounds = array<i64: 104, 128>}, {pipeline_mode = #tpu.pipeline_mode<synchronous>, transform_indices = @transform_3, window_bounds = array<i64: 1, 128>}, {pipeline_mode = #tpu.pipeline_mode<synchronous>, transform_indices = @transform_4, window_bounds = array<i64: 1, 128>}]} {
    %c0 = arith.constant 0 : index
    %c0_0 = arith.constant 0 : index
    %0 = vector.load %arg1[%c0, %c0_0] : memref<104x128xbf16, #tpu.memory_space<vmem>>, vector<104x128xbf16>
    %c0_1 = arith.constant 0 : index
    %c0_2 = arith.constant 0 : index
    %1 = vector.load %arg2[%c0_1, %c0_2] : memref<128x128xbf16, #tpu.memory_space<vmem>>, vector<128x128xbf16>
    %cst = arith.constant dense<0.000000e+00> : vector<104x128xf32>
    %2 = tpu.matmul %0, %1, %cst {dimension_numbers = #tpu.dot_dimension_numbers<[1], [0], [0], [1], [0, 0, 1, 1], [], []>} : vector<104x128xbf16>, vector<128x128xbf16>, vector<104x128xf32> -> vector<104x128xf32>
    %c0_3 = arith.constant 0 : index
    %c0_4 = arith.constant 0 : index
    %3 = vector.load %arg3[%c0_3, %c0_4] : memref<104x128xf32, #tpu.memory_space<vmem>>, vector<104x128xf32>
    tpu.vector_store %arg3[%c0_3, %c0_4], %2 {strides = array<i32>} : memref<104x128xf32, #tpu.memory_space<vmem>>, vector<104x128xf32>,
    %c0_i32 = arith.constant 0 : i32
    %4 = arith.cmpi eq, %arg0, %c0_i32 : i32
    %5 = arith.extui %4 : i1 to i32
    %c0_i32_5 = arith.constant 0 : i32
    %6 = arith.cmpi ne, %5, %c0_i32_5 : i32
    scf.if %6 {
      %cst_16 = arith.constant 0.000000e+00 : f32
      %18 = vector.broadcast %cst_16 : f32 to vector<1x128xf32>
      %c0_17 = arith.constant 0 : index
      %c0_18 = arith.constant 0 : index
      %19 = vector.load %arg4[%c0_17, %c0_18] : memref<1x128xf32, #tpu.memory_space<vmem>>, vector<1x128xf32>
      tpu.vector_store %arg4[%c0_17, %c0_18], %18 {strides = array<i32>} : memref<1x128xf32, #tpu.memory_space<vmem>>, vector<1x128xf32>,
      %cst_19 = arith.constant 0.000000e+00 : f32
      %20 = vector.broadcast %cst_19 : f32 to vector<1x128xf32>
      %c0_20 = arith.constant 0 : index
      %c0_21 = arith.constant 0 : index
      %21 = vector.load %arg5[%c0_20, %c0_21] : memref<1x128xf32, #tpu.memory_space<vmem>>, vector<1x128xf32>
      tpu.vector_store %arg5[%c0_20, %c0_21], %20 {strides = array<i32>} : memref<1x128xf32, #tpu.memory_space<vmem>>, vector<1x128xf32>,
    } else {
    }
    %c0_6 = arith.constant 0 : index
    %c0_7 = arith.constant 0 : index
    %7 = vector.load %arg4[%c0_6, %c0_7] : memref<1x128xf32, #tpu.memory_space<vmem>>, vector<1x128xf32>
    %cst_8 = arith.constant dense<0.000000e+00> : vector<128xf32>
    %8 = vector.multi_reduction <add>, %2, %cst_8 [0] : vector<104x128xf32> to vector<128xf32>
    %9 = vector.shape_cast %8 : vector<128xf32> to vector<1x128xf32>
    %10 = arith.addf %7, %9 : vector<1x128xf32>
    %c0_9 = arith.constant 0 : index
    %c0_10 = arith.constant 0 : index
    %11 = vector.load %arg4[%c0_9, %c0_10] : memref<1x128xf32, #tpu.memory_space<vmem>>, vector<1x128xf32>
    tpu.vector_store %arg4[%c0_9, %c0_10], %10 {strides = array<i32>} : memref<1x128xf32, #tpu.memory_space<vmem>>, vector<1x128xf32>,
    %c0_11 = arith.constant 0 : index
    %c0_12 = arith.constant 0 : index
    %12 = vector.load %arg5[%c0_11, %c0_12] : memref<1x128xf32, #tpu.memory_space<vmem>>, vector<1x128xf32>
    %13 = arith.mulf %2, %2 : vector<104x128xf32>
    %cst_13 = arith.constant dense<0.000000e+00> : vector<128xf32>
    %14 = vector.multi_reduction <add>, %13, %cst_13 [0] : vector<104x128xf32> to vector<128xf32>
    %15 = vector.shape_cast %14 : vector<128xf32> to vector<1x128xf32>
    %16 = arith.addf %12, %15 : vector<1x128xf32>
    %c0_14 = arith.constant 0 : index
    %c0_15 = arith.constant 0 : index
    %17 = vector.load %arg5[%c0_14, %c0_15] : memref<1x128xf32, #tpu.memory_space<vmem>>, vector<1x128xf32>
    tpu.vector_store %arg5[%c0_14, %c0_15], %16 {strides = array<i32>} : memref<1x128xf32, #tpu.memory_space<vmem>>, vector<1x128xf32>,
    return
  }
  func.func @transform_0(%arg0: i32) -> (i32, i32) {
    %c0_i32 = arith.constant 0 : i32
    %c0_i32_0 = arith.constant 0 : i32
    return %arg0, %c0_i32 : i32, i32
  }
  func.func @transform_1(%arg0: i32) -> (i32, i32) {
    %c0_i32 = arith.constant 0 : i32
    %c0_i32_0 = arith.constant 0 : i32
    %c0_i32_1 = arith.constant 0 : i32
    return %c0_i32, %c0_i32_0 : i32, i32
  }
  func.func @transform_2(%arg0: i32) -> (i32, i32) {
    %c0_i32 = arith.constant 0 : i32
    %c0_i32_0 = arith.constant 0 : i32
    return %arg0, %c0_i32 : i32, i32
  }
  func.func @transform_3(%arg0: i32) -> (i32, i32) {
    %c0_i32 = arith.constant 0 : i32
    %c0_i32_0 = arith.constant 0 : i32
    %c0_i32_1 = arith.constant 0 : i32
    return %c0_i32, %c0_i32_0 : i32, i32
  }
  func.func @transform_4(%arg0: i32) -> (i32, i32) {
    %c0_i32 = arith.constant 0 : i32
    %c0_i32_0 = arith.constant 0 : i32
    %c0_i32_1 = arith.constant 0 : i32
    return %c0_i32, %c0_i32_0 : i32, i32
  }
}

module attributes {stable_mosaic.version = 11 : i64} {
  func.func @_bn_lrelu_kernel(%arg0: i32, %arg1: memref<104x128xf32, #tpu.memory_space<vmem>>, %arg2: memref<1x128xf32, #tpu.memory_space<vmem>>, %arg3: memref<1x128xf32, #tpu.memory_space<vmem>>, %arg4: memref<104x128xf32, #tpu.memory_space<vmem>>) attributes {dimension_semantics = [#tpu.dimension_semantics<parallel>], iteration_bounds = array<i64: 1>, scalar_prefetch = 0 : i64, scratch_operands = 0 : i64, tpu.core_type = #tpu.core_type<tc>, window_params = [{transform_indices = @transform_0, window_bounds = array<i64: 104, 128>}, {pipeline_mode = #tpu.pipeline_mode<synchronous>, transform_indices = @transform_1, window_bounds = array<i64: 1, 128>}, {pipeline_mode = #tpu.pipeline_mode<synchronous>, transform_indices = @transform_2, window_bounds = array<i64: 1, 128>}, {transform_indices = @transform_3, window_bounds = array<i64: 104, 128>}]} {
    %c0 = arith.constant 0 : index
    %c0_0 = arith.constant 0 : index
    %0 = vector.load %arg1[%c0, %c0_0] : memref<104x128xf32, #tpu.memory_space<vmem>>, vector<104x128xf32>
    %c0_1 = arith.constant 0 : index
    %c0_2 = arith.constant 0 : index
    %1 = vector.load %arg2[%c0_1, %c0_2] : memref<1x128xf32, #tpu.memory_space<vmem>>, vector<1x128xf32>
    %2 = vector.broadcast %1 : vector<1x128xf32> to vector<104x128xf32>
    %3 = arith.mulf %0, %2 : vector<104x128xf32>
    %c0_3 = arith.constant 0 : index
    %c0_4 = arith.constant 0 : index
    %4 = vector.load %arg3[%c0_3, %c0_4] : memref<1x128xf32, #tpu.memory_space<vmem>>, vector<1x128xf32>
    %5 = vector.broadcast %4 : vector<1x128xf32> to vector<104x128xf32>
    %6 = arith.addf %3, %5 : vector<104x128xf32>
    %cst = arith.constant 0.000000e+00 : f32
    %7 = vector.broadcast %cst : f32 to vector<104x128xf32>
    %8 = arith.cmpf ogt, %6, %7 : vector<104x128xf32>
    %cst_5 = arith.constant 2.000000e-01 : f32
    %9 = vector.broadcast %cst_5 : f32 to vector<104x128xf32>
    %10 = arith.mulf %9, %6 : vector<104x128xf32>
    %11 = arith.select %8, %6, %10 : vector<104x128xi1>, vector<104x128xf32>
    %c0_6 = arith.constant 0 : index
    %c0_7 = arith.constant 0 : index
    %12 = vector.load %arg4[%c0_6, %c0_7] : memref<104x128xf32, #tpu.memory_space<vmem>>, vector<104x128xf32>
    tpu.vector_store %arg4[%c0_6, %c0_7], %11 {strides = array<i32>} : memref<104x128xf32, #tpu.memory_space<vmem>>, vector<104x128xf32>,
    return
  }
  func.func @transform_0(%arg0: i32) -> (i32, i32) {
    %c0_i32 = arith.constant 0 : i32
    %c0_i32_0 = arith.constant 0 : i32
    return %arg0, %c0_i32 : i32, i32
  }
  func.func @transform_1(%arg0: i32) -> (i32, i32) {
    %c0_i32 = arith.constant 0 : i32
    %c0_i32_0 = arith.constant 0 : i32
    %c0_i32_1 = arith.constant 0 : i32
    return %c0_i32, %c0_i32_0 : i32, i32
  }
  func.func @transform_2(%arg0: i32) -> (i32, i32) {
    %c0_i32 = arith.constant 0 : i32
    %c0_i32_0 = arith.constant 0 : i32
    %c0_i32_1 = arith.constant 0 : i32
    return %c0_i32, %c0_i32_0 : i32, i32
  }
  func.func @transform_3(%arg0: i32) -> (i32, i32) {
    %c0_i32 = arith.constant 0 : i32
    %c0_i32_0 = arith.constant 0 : i32
    return %arg0, %c0_i32 : i32, i32
  }
}

</mosaic_0001>

<bundles_post_ra>
// kernel: cnn_block_forward.3
= control target key start
LH: loop header
LB: loop body
LE: loop exit
PB: predicated region body
PF: predicated region fallthrough
CT: control target
= control target key end

     0   :  { %s253_s0 = inlined_call_operand.vmem [shape: f32[104,128], index: 0, kind: input, shape index: {}]   ;;  %s254_s1 = inlined_call_operand.vmem [shape: f32[1,128], index: 1, kind: input, shape index: {}]   ;;  %s255_s2 = inlined_call_operand.vmem [shape: f32[1,128], index: 2, kind: input, shape index: {}]   ;;  %s256_s3 = inlined_call_operand.vmem [shape: f32[104,128], index: 3, kind: output, shape index: {}]  }
   0x1   :  { %v14_v0 = vld [vmem:[%s253_s0] sm:$0xff]  ;;  %v15_v3 = vld [vmem:[%s253_s0 + $0x8] sm:$0xff]  ;;  %v16_v6 = vld [vmem:[%s253_s0 + $0x10] sm:$0xff] }
   0x2   :  { %v145_v1 = vld [vmem:[%s254_s1] ss:$0 sm:$0xff]  ;;  %v17_v7 = vld [vmem:[%s253_s0 + $0x18] sm:$0xff]  ;;  %v19_v12 = vld [vmem:[%s253_s0 + $0x28] sm:$0xff] }
   0x3   :  { %v150_v2 = vld [vmem:[%s255_s2] ss:$0 sm:$0xff]  ;;  %v31_v4 = vmul.f32 %v145_v1, %v14_v0  ;;  %v32_v5 = vmul.f32 %v145_v1, %v15_v3  ;;  %v33_v9 = vmul.f32 %v145_v1, %v16_v6  ;;  %v34_v10 = vmul.f32 %v145_v1, %v17_v7  ;;  %v20_v13 = vld [vmem:[%s253_s0 + $0x30] sm:$0xff]  ;;  %v21_v14 = vld [vmem:[%s253_s0 + $0x38] sm:$0xff] }
   0x4   :  { %v18_v8 = vld [vmem:[%s253_s0 + $0x20] sm:$0xff]  ;;  %v36_v17 = vmul.f32 %v145_v1, %v19_v12  ;;  %v37_v18 = vmul.f32 %v145_v1, %v20_v13  ;;  %v38_v22 = vmul.f32 %v145_v1, %v21_v14  ;;  %v23_v24 = vld [vmem:[%s253_s0 + $0x48] sm:$0xff]  ;;  %v24_v32 = vld [vmem:[%s253_s0 + $0x50] sm:$0xff] }
   0x5   :  { %v35_v11 = vmul.f32 %v145_v1, %v18_v8  ;;  %v48_v15 = vadd.f32 %v150_v2, %v31_v4  ;;  %v49_v16 = vadd.f32 %v150_v2, %v32_v5  ;;  %v50_v19 = vadd.f32 %v150_v2, %v33_v9  ;;  %v22_v23 = vld [vmem:[%s253_s0 + $0x40] sm:$0xff]  ;;  %v25_v41 = vld [vmem:[%s253_s0 + $0x58] sm:$0xff] }
   0x6   :  { %v51_v20 = vadd.f32 %v150_v2, %v34_v10  ;;  %v53_v35 = vadd.f32 %v150_v2, %v36_v17  ;;  %v54_v36 = vadd.f32 %v150_v2, %v37_v18  ;;  %v55_v38 = vadd.f32 %v150_v2, %v38_v22  ;;  %v26_v51 = vld [vmem:[%s253_s0 + $0x60] sm:$0xff] }
   0x7   :  { %v52_v21 = vadd.f32 %v150_v2, %v35_v11  ;;  %vm61_vm0 = vcmp.gt.f32.partialorder %v48_v15, 0.0  ;;  %v74_v25 = vmul.f32 0.2, %v48_v15  ;;  %vm62_vm1 = vcmp.gt.f32.partialorder %v49_v16, 0.0 }
   0x8   :  { %v75_v26 = vmul.f32 0.2, %v49_v16  ;;  %vm63_vm2 = vcmp.gt.f32.partialorder %v50_v19, 0.0  ;;  %v76_v27 = vmul.f32 0.2, %v50_v19  ;;  %vm64_vm3 = vcmp.gt.f32.partialorder %v51_v20, 0.0 }
   0x9   :  { %v77_v28 = vmul.f32 0.2, %v51_v20  ;;  %v87_v29 = vsel %vm61_vm0, %v48_v15, %v74_v25  ;;  %vm65_vm4 = vcmp.gt.f32.partialorder %v52_v21, 0.0  ;;  %v78_v31 = vmul.f32 0.2, %v52_v21 }
   0xa   :  { %v88_v30 = vsel %vm62_vm1, %v49_v16, %v75_v26  ;;  %100 = vst [vmem:[%s256_s3] sm:$0xff] %v87_v29  ;;  %v89_v33 = vsel %vm63_vm2, %v50_v19, %v76_v27  ;;  %v39_v39 = vmul.f32 %v145_v1, %v22_v23  ;;  %v40_v40 = vmul.f32 %v145_v1, %v23_v24 }
   0xb   :  { %v90_v34 = vsel %vm64_vm3, %v51_v20, %v77_v28  ;;  %101 = vst [vmem:[%s256_s3 + $0x8] sm:$0xff] %v88_v30  ;;  %v91_v37 = vsel %vm65_vm4, %v52_v21, %v78_v31  ;;  %vm66_vm5 = vcmp.gt.f32.partialorder %v53_v35, 0.0  ;;  %v79_v42 = vmul.f32 0.2, %v53_v35 }
   0xc   :  { %102 = vst [vmem:[%s256_s3 + $0x10] sm:$0xff] %v89_v33  ;;  %vm67_vm6 = vcmp.gt.f32.partialorder %v54_v36, 0.0  ;;  %v41_v43 = vmul.f32 %v145_v1, %v24_v32  ;;  %v80_v44 = vmul.f32 0.2, %v54_v36  ;;  %vm68_vm7 = vcmp.gt.f32.partialorder %v55_v38, 0.0 }
   0xd   :  { %103 = vst [vmem:[%s256_s3 + $0x18] sm:$0xff] %v90_v34  ;;  %v81_v45 = vmul.f32 0.2, %v55_v38  ;;  %v56_v46 = vadd.f32 %v150_v2, %v39_v39  ;;  %v92_v47 = vsel %vm66_vm5, %v53_v35, %v79_v42  ;;  %v57_v48 = vadd.f32 %v150_v2, %v40_v40 }
   0xe   :  { %104 = vst [vmem:[%s256_s3 + $0x20] sm:$0xff] %v91_v37  ;;  %v58_v49 = vadd.f32 %v150_v2, %v41_v43  ;;  %v42_v50 = vmul.f32 %v145_v1, %v25_v41  ;;  %v93_v52 = vsel %vm67_vm6, %v54_v36, %v80_v44  ;;  %v43_v59 = vmul.f32 %v145_v1, %v26_v51 }
   0xf   :  { %105 = vst [vmem:[%s256_s3 + $0x28] sm:$0xff] %v92_v47  ;;  %v94_v53 = vsel %vm68_vm7, %v55_v38, %v81_v45  ;;  %vm69_vm8 = vcmp.gt.f32.partialorder %v56_v46, 0.0  ;;  %v82_v54 = vmul.f32 0.2, %v56_v46  ;;  %vm70_vm9 = vcmp.gt.f32.partialorder %v57_v48, 0.0 }
  0x10   :  { %106 = vst [vmem:[%s256_s3 + $0x30] sm:$0xff] %v93_v52  ;;  %v83_v55 = vmul.f32 0.2, %v57_v48  ;;  %vm71_vm10 = vcmp.gt.f32.partialorder %v58_v49, 0.0  ;;  %v59_v56 = vadd.f32 %v150_v2, %v42_v50  ;;  %v84_v58 = vmul.f32 0.2, %v58_v49 }
  0x11   :  { %107 = vst [vmem:[%s256_s3 + $0x38] sm:$0xff] %v94_v53  ;;  %v95_v57 = vsel %vm69_vm8, %v56_v46, %v82_v54  ;;  %v60_v63 = vadd.f32 %v150_v2, %v43_v59 }
  0x12   :  { %108 = vst [vmem:[%s256_s3 + $0x40] sm:$0xff] %v95_v57  ;;  %v96_v60 = vsel %vm70_vm9, %v57_v48, %v83_v55  ;;  %vm72_vm11 = vcmp.gt.f32.partialorder %v59_v56, 0.0  ;;  %v85_v61 = vmul.f32 0.2, %v59_v56  ;;  %v97_v62 = vsel %vm71_vm10, %v58_v49, %v84_v58 }
  0x13   :  { %109 = vst [vmem:[%s256_s3 + $0x48] sm:$0xff] %v96_v60  ;;  %vm73_vm12 = vcmp.gt.f32.partialorder %v60_v63, 0.0  ;;  %v86_v1 = vmul.f32 0.2, %v60_v63 }
  0x14   :  { %110 = vst [vmem:[%s256_s3 + $0x50] sm:$0xff] %v97_v62  ;;  %v98_v0 = vsel %vm72_vm11, %v59_v56, %v85_v61 }
  0x15   :  { %111 = vst [vmem:[%s256_s3 + $0x58] sm:$0xff] %v98_v0  ;;  %v99_v3 = vsel %vm73_vm12, %v60_v63, %v86_v1 }
  0x16   :  { %112 = vst [vmem:[%s256_s3 + $0x60] sm:$0xff] %v99_v3 }

// kernel: cnn_block_forward.2
= control target key start
LH: loop header
LB: loop body
LE: loop exit
PB: predicated region body
PF: predicated region fallthrough
CT: control target
= control target key end

     0   :  { %v355_v19 = vmov 0.0   ;;  %s483_s1 = inlined_call_operand.vmem [shape: bf16[128,128], index: 1, kind: input, shape index: {}]   ;;  %s484_s0 = inlined_call_operand.vmem [shape: bf16[104,128], index: 0, kind: input, shape index: {}]   ;;  %s485_s2 = inlined_call_operand.vmem [shape: f32[104,128], index: 2, kind: output, shape index: {0}]   ;;  %s486_s3 = inlined_call_operand.vmem [shape: f32[1,128], index: 3, kind: output, shape index: {1}]   ;;  %s487_s4 = inlined_call_operand.vmem [shape: f32[1,128], index: 4, kind: output, shape index: {2}]  }
   0x1   :  { %v329_v0 = vld [vmem:[%s483_s1 + $0x38] sm:$0xff]  ;;  %v328_v1 = vld [vmem:[%s483_s1 + $0x30] sm:$0xff]  ;;  %v327_v2 = vld [vmem:[%s483_s1 + $0x28] sm:$0xff]  ;;  %191 = vst [vmem:[%s486_s3] sm:$0x1] %v355_v19 }
   0x2   :  { %131 = vmatpush.bf16.msra.mxu0 %v329_v0  ;;  %330 = vmatpush.bf16.msra.mxu1 %v329_v0  ;;  %v326_v3 = vld [vmem:[%s483_s1 + $0x20] sm:$0xff]  ;;  %v325_v4 = vld [vmem:[%s483_s1 + $0x18] sm:$0xff]  ;;  %v324_v5 = vld [vmem:[%s483_s1 + $0x10] sm:$0xff]  ;;  %192 = vst [vmem:[%s487_s4] sm:$0x1] %v355_v19 }
   0x3   :  { %331 = vmatpush.bf16.msra.mxu2 %v329_v0  ;;  %332 = vmatpush.bf16.msra.mxu3 %v329_v0  ;;  %v323_v6 = vld [vmem:[%s483_s1 + $0x8] sm:$0xff]  ;;  %v322_v7 = vld [vmem:[%s483_s1] sm:$0xff]  ;;  %v319_v10 = vld [vmem:[%s484_s0 + $0x18] sm:$0xff] }
   0x4   :  { %v316_v8 = vld [vmem:[%s484_s0] sm:$0xff]  ;;  %v317_v9 = vld [vmem:[%s484_s0 + $0x8] sm:$0xff]  ;;  %v26_v12 = vld [vmem:[%s484_s0 + $0x30] sm:$0xf] }
   0x5   :  { %v321_v11 = vld [vmem:[%s484_s0 + $0x28] sm:$0xff]  ;;  %v68_v13 = vunpack.c.l.b16 %v26_v12  ;;  %v318_v14 = vld [vmem:[%s484_s0 + $0x10] sm:$0xff]  ;;  %v320_v15 = vld [vmem:[%s484_s0 + $0x20] sm:$0xff] }
   0x6   :  { %132 = vmatpush.bf16.msra.mxu0 %v328_v1  ;;  %333 = vmatpush.bf16.msra.mxu1 %v328_v1 }
   0x7   :  { %334 = vmatpush.bf16.msra.mxu2 %v328_v1  ;;  %335 = vmatpush.bf16.msra.mxu3 %v328_v1  ;;  %v75_v16 = vpack.c.b16 %v68_v13, %v68_v13 }
   0xa   :  { %133 = vmatpush.bf16.msra.mxu0 %v327_v2  ;;  %336 = vmatpush.bf16.msra.mxu1 %v327_v2 }
   0xb   :  { %337 = vmatpush.bf16.msra.mxu2 %v327_v2  ;;  %338 = vmatpush.bf16.msra.mxu3 %v327_v2 }
   0xe   :  { %134 = vmatpush.bf16.msra.mxu0 %v326_v3  ;;  %339 = vmatpush.bf16.msra.mxu1 %v326_v3 }
   0xf   :  { %340 = vmatpush.bf16.msra.mxu2 %v326_v3  ;;  %341 = vmatpush.bf16.msra.mxu3 %v326_v3 }
  0x12   :  { %135 = vmatpush.bf16.msra.mxu0 %v325_v4  ;;  %342 = vmatpush.bf16.msra.mxu1 %v325_v4 }
  0x13   :  { %343 = vmatpush.bf16.msra.mxu2 %v325_v4  ;;  %344 = vmatpush.bf16.msra.mxu3 %v325_v4 }
  0x16   :  { %136 = vmatpush.bf16.msra.mxu0 %v324_v5  ;;  %345 = vmatpush.bf16.msra.mxu1 %v324_v5 }
  0x17   :  { %346 = vmatpush.bf16.msra.mxu2 %v324_v5  ;;  %347 = vmatpush.bf16.msra.mxu3 %v324_v5 }
  0x1a   :  { %137 = vmatpush.bf16.msra.mxu0 %v323_v6  ;;  %348 = vmatpush.bf16.msra.mxu1 %v323_v6 }
  0x1b   :  { %349 = vmatpush.bf16.msra.mxu2 %v323_v6  ;;  %350 = vmatpush.bf16.msra.mxu3 %v323_v6 }
  0x1e   :  { %138 = vmatpush.bf16.msra.mxu0 %v322_v7  ;;  %351 = vmatpush.bf16.msra.mxu1 %v322_v7 }
  0x1f   :  { %352 = vmatpush.bf16.msra.mxu2 %v322_v7  ;;  %353 = vmatpush.bf16.msra.mxu3 %v322_v7 }
  0x21   :  { %139 = vmatmul.bf16.vlgmr.msra.gmra.mxu0 %v316_v8  ;;  %144 = vmatmul.bf16.vlgmr.msra.gmra.mxu1 %v317_v9 }
  0x22   :  { %154 = vmatmul.bf16.vlgmr.msra.gmra.mxu2 %v319_v10  ;;  %164 = vmatmul.bf16.vlgmr.msra.gmra.mxu3 %v321_v11 }
  0x31   :  { %149 = vmatmul.bf16.gmra.mxu1 %v318_v14  ;;  %v193_v14 = vld [vmem:[%s486_s3] sm:$0x1] }
  0x32   :  { %159 = vmatmul.bf16.gmra.mxu2 %v320_v15  ;;  %169 = vmatmul.bf16.gmra.mxu3 %v75_v16 }
  0x9e   :  { %v140_v17 = vpop.f32.mrf.mxu0  ;;  %v145_v18 = vpop.f32.mrf.mxu1 }
  0x9f   :  { %174 = vst [vmem:[%s485_s2] sm:$0xff] %v140_v17  ;;  %v215_v24 = vmul.f32 %v140_v17, %v140_v17  ;;  %v217_v31 = vmul.f32 %v145_v18, %v145_v18 }
  0xa0   :  { %176 = vst [vmem:[%s485_s2 + $0x10] sm:$0xff] %v145_v18 }
  0xa5   :  { %v155_v20 = vpop.f32.mrf.mxu2  ;;  %v165_v21 = vpop.f32.mrf.mxu3 }
  0xa6   :  { %180 = vst [vmem:[%s485_s2 + $0x30] sm:$0xff] %v155_v20  ;;  %v142_v22 = vpop.f32.mrf.mxu0  ;;  %v147_v23 = vpop.f32.mrf.mxu1  ;;  %v221_v45 = vmul.f32 %v155_v20, %v155_v20  ;;  %v225_v59 = vmul.f32 %v165_v21, %v165_v21 }
  0xa7   :  { %175 = vst [vmem:[%s485_s2 + $0x8] sm:$0xff] %v142_v22  ;;  %v216_v25 = vmul.f32 %v142_v22, %v142_v22  ;;  %v194_v26 = vadd.f32 %v142_v22, %v140_v17  ;;  %v218_v35 = vmul.f32 %v147_v23, %v147_v23  ;;  %v214_v17 = vld [vmem:[%s487_s4] sm:$0x1] }
  0xa8   :  { %177 = vst [vmem:[%s485_s2 + $0x18] sm:$0xff] %v147_v23 }
  0xa9   :  { %184 = vst [vmem:[%s485_s2 + $0x50] sm:$0xff] %v165_v21  ;;  %v228_v27 = vadd.f32 %v216_v25, %v215_v24  ;;  %v195_v32 = vadd.f32 %v194_v26, %v145_v18 }
  0xab   :  { %v229_v33 = vadd.f32 %v228_v27, %v217_v31  ;;  %v196_v34 = vadd.f32 %v195_v32, %v147_v23 }
  0xad   :  { %v157_v28 = vpop.f32.mrf.mxu2  ;;  %v167_v29 = vpop.f32.mrf.mxu3  ;;  %v230_v37 = vadd.f32 %v229_v33, %v218_v35 }
  0xae   :  { %181 = vst [vmem:[%s485_s2 + $0x38] sm:$0xff] %v157_v28  ;;  %v150_v30 = vpop.f32.mrf.mxu1  ;;  %v222_v48 = vmul.f32 %v157_v28, %v157_v28  ;;  %v226_v62 = vmul.f32 %v167_v29, %v167_v29 }
  0xaf   :  { %178 = vst [vmem:[%s485_s2 + $0x20] sm:$0xff] %v150_v30  ;;  %v219_v36 = vmul.f32 %v150_v30, %v150_v30  ;;  %v197_v38 = vadd.f32 %v196_v34, %v150_v30 }
  0xb0   :  { %185 = vst [vmem:[%s485_s2 + $0x58] sm:$0xff] %v167_v29 }
  0xb1   :  { %v231_v42 = vadd.f32 %v230_v37, %v219_v36 }
  0xb5   :  { %v160_v39 = vpop.f32.mrf.mxu2  ;;  %v170_v40 = vpop.f32.mrf.mxu3 }
  0xb6   :  { %182 = vst [vmem:[%s485_s2 + $0x40] sm:$0xff] %v160_v39  ;;  %v152_v41 = vpop.f32.mrf.mxu1  ;;  %v223_v51 = vmul.f32 %v160_v39, %v160_v39  ;;  %v227_v1 = vmul.f32 %v170_v40, %v170_v40 }
  0xb7   :  { %179 = vst [vmem:[%s485_s2 + $0x28] sm:$0xff] %v152_v41  ;;  %v198_v43 = vadd.f32 %v197_v38, %v152_v41  ;;  %v220_v44 = vmul.f32 %v152_v41, %v152_v41 }
  0xb8   :  { %186 = vst [vmem:[%s485_s2 + $0x60] sm:$0xff] %v170_v40 }
  0xb9   :  { %v199_v46 = vadd.f32 %v198_v43, %v155_v20  ;;  %v232_v47 = vadd.f32 %v231_v42, %v220_v44 }
  0xbb   :  { %v233_v49 = vadd.f32 %v232_v47, %v221_v45  ;;  %v200_v50 = vadd.f32 %v199_v46, %v157_v28 }
  0xbd   :  { %v162_v52 = vpop.f32.mrf.mxu2  ;;  %v201_v53 = vadd.f32 %v200_v50, %v160_v39  ;;  %v234_v54 = vadd.f32 %v233_v49, %v222_v48  ;;  %v172_v55 = vpop.f32.mrf.mxu3 }
  0xbe   :  { %183 = vst [vmem:[%s485_s2 + $0x48] sm:$0xff] %v162_v52  ;;  %v224_v57 = vmul.f32 %v162_v52, %v162_v52 }
  0xbf   :  { %v202_v56 = vadd.f32 %v201_v53, %v162_v52  ;;  %v235_v58 = vadd.f32 %v234_v54, %v223_v51 }
  0xc1   :  { %v203_v60 = vadd.f32 %v202_v56, %v165_v21  ;;  %v236_v61 = vadd.f32 %v235_v58, %v224_v57 }
  0xc3   :  { %v237_v63 = vadd.f32 %v236_v61, %v225_v59  ;;  %v204_v0 = vadd.f32 %v203_v60, %v167_v29 }
  0xc5   :  { %v205_v2 = vadd.f32 %v204_v0, %v170_v40  ;;  %v238_v3 = vadd.f32 %v237_v63, %v226_v62 }
  0xc7   :  { %v206_v4 = vrot.slane %v205_v2, 4  ;;  %v239_v5 = vadd.f32 %v238_v3, %v227_v1 }
  0xc9   :  { %v207_v6 = vadd.f32 %v206_v4, %v205_v2  ;;  %v240_v7 = vrot.slane %v239_v5, 4 }
  0xcb   :  { %v208_v8 = vrot.slane %v207_v6, 2  ;;  %v241_v9 = vadd.f32 %v240_v7, %v239_v5 }
  0xcd   :  { %v209_v10 = vadd.f32 %v208_v8, %v207_v6  ;;  %v242_v11 = vrot.slane %v241_v9, 2 }
  0xcf   :  { %v210_v12 = vrot.slane %v209_v10, 1  ;;  %v243_v13 = vadd.f32 %v242_v11, %v241_v9 }
  0xd1   :  { %v211_v15 = vadd.f32 %v210_v12, %v209_v10  ;;  %v244_v16 = vrot.slane %v243_v13, 1 }
  0xd3   :  { %v212_v18 = vadd.f32 %v211_v15, %v193_v14  ;;  %v245_v19 = vadd.f32 %v244_v16, %v243_v13 }
  0xd5   :  { %213 = vst [vmem:[%s486_s3] sm:$0x1] %v212_v18  ;;  %v246_v20 = vadd.f32 %v245_v19, %v214_v17 }
  0xd7   :  { %247 = vst [vmem:[%s487_s4] sm:$0x1] %v246_v20 }

</bundles_post_ra>
